<compile_context>
chip_gen: v5e
topology: v5e:2x2
jax: 0.10.0
libtpu: 0.0.40
codegen_flags: <defaults>
</compile_context>

<pallas_src>
import functools

import jax
import jax.numpy as jnp
from jax.experimental import pallas as pl
from jax.experimental.pallas import tpu as pltpu


# --------------------------- Pallas kernel ---------------------------

def _snconv_act_kernel(p_ref, w_ref, b_ref, o_ref, acc_ref):
    """One (batch, Cout-tile, spatial-tile, K-tile) grid step.

    p_ref  : (1, tK, T)    bf16 im2col patch tile (T lane-dense)
    w_ref  : (tCo, tK)     bf16 spectrally-normalized weight tile
    b_ref  : (tCo, 1)      f32 bias tile
    o_ref  : (1, tCo, T)   output tile (lane-dense last dim)
    acc_ref: (tCo, T)      f32 accumulator scratch (persists over the K axis)
    """
    k = pl.program_id(3)

    @pl.when(k == 0)
    def _():
        acc_ref[...] = jnp.zeros_like(acc_ref)

    # bf16 x bf16 -> f32 accumulate on the MXU.
    acc_ref[...] += jax.lax.dot_general(
        w_ref[...], p_ref[0], (((1,), (0,)), ((), ())),
        preferred_element_type=jnp.float32)

    @pl.when(k == pl.num_programs(3) - 1)
    def _():
        y = acc_ref[...] + b_ref[...]            # (tCo, 1) broadcast over lanes
        o_ref[0] = jnp.maximum(y, 0.2 * y).astype(o_ref.dtype)   # LeakyReLU(0.2)


# --------------------------- wrapper / glue ---------------------------

def _round_up(x, m):
    return ((x + m - 1) // m) * m


def _spectral_normalize(weight, n_iters=10, eps=1e-12):
    """Fold spectral norm into the conv weight: weight / sigma_max(weight.reshape(Cout,-1)).

    Deterministic power iteration on a tiny (Cout, Cin*kh*kw) matrix in plain JAX.
    Note: torch.nn.utils.spectral_norm runs ONE iteration per forward with a
    persistent random u; the converged sigma here is the inference-time
    equivalent (close, not bit-matching).
    """
    cout = weight.shape[0]
    w_mat = weight.reshape(cout, -1)
    u = jnp.ones((cout,), weight.dtype) / jnp.sqrt(jnp.asarray(cout, weight.dtype))
    for _ in range(n_iters):
        v = w_mat.T @ u
        v = v / (jnp.linalg.norm(v) + eps)
        u = w_mat @ v
        u = u / (jnp.linalg.norm(u) + eps)
    v = w_mat.T @ u
    v = v / (jnp.linalg.norm(v) + eps)
    sigma = u @ (w_mat @ v)
    return weight / sigma


def _im2col_nchw_bf16(x_nchw, kernel_size, stride, padding, dilation=1):
    """Build the (N, kh*kw*Cin, Ho*Wo) patch matrix directly in bf16."""
    N, Cin, H, W = x_nchw.shape
    kh, kw = kernel_size
    sh, sw = stride
    ph, pw = padding
    Ho = (H + 2 * ph - dilation * (kh - 1) - 1) // sh + 1
    Wo = (W + 2 * pw - dilation * (kw - 1) - 1) // sw + 1
    xp = jnp.pad(x_nchw.astype(jnp.bfloat16), ((0, 0), (0, 0), (ph, ph), (pw, pw)))
    taps = []
    for dh in range(kh):
        for dw in range(kw):
            h0, w0 = dh * dilation, dw * dilation
            taps.append(xp[:, :, h0:h0 + sh * Ho:sh, w0:w0 + sw * Wo:sw])
    # (N, kh*kw, Cin, Ho, Wo) -> (N, kh*kw*Cin, Ho*Wo); index = tap*Cin + cin
    patches = jnp.stack(taps, axis=1).reshape(N, kh * kw * Cin, Ho * Wo)
    return patches, Ho, Wo


def _pick_tiles(K_pad, Cout_pad, HWo, out_bytes, budget_bytes=20 * 1024 * 1024):
    """VMEM-budget-aware tile selection (MXU-aligned channel/contract tiles)."""
    # Contraction tile (256 matches the v6e/v7x MXU edge; 128 minimum / v5e).
    tK = 256 if (K_pad % 256 == 0 and K_pad >= 256) else min(K_pad, 128)
    # Cout tile.
    if Cout_pad % 256 == 0:
        tCo = 256
    elif Cout_pad % 128 == 0:
        tCo = 128
    else:
        tCo = Cout_pad
    # Spatial tile: lane-dense multiple of 128, sized so double-buffered blocks
    # plus the f32 accumulator fit inside the budget.
    fixed = 2 * tCo * tK * 2 + 2 * tCo * 4                   # weight (bf16) + bias (f32), x2 buffers
    per_t = 2 * tK * 2 + 2 * tCo * out_bytes + tCo * 4       # patch + out (x2 buffers) + acc
    t_budget = max(budget_bytes - fixed, per_t * 128) // per_t
    T = max(128, (t_budget // 128) * 128)
    T = min(T, 4096)
    T = min(T, _round_up(HWo, 128))
    return tK, tCo, T


def sn_conv_with_activation(x_nchw, weight, bias, *, stride=1, padding=0,
                            dilation=1, sn_iters=10, out_dtype=None):
    """Forward pass of SNConvWithActivation: spectral-norm Conv2d + LeakyReLU(0.2).

    x_nchw : (N, Cin, H, W)   weight : (Cout, Cin, kh, kw)   bias : (Cout,)
    Returns (N, Cout, Ho, Wo) in NCHW.
    """
    N, Cin, H, W = x_nchw.shape
    Cout, Cin_w, kh, kw = weight.shape
    assert Cin_w == Cin, "groups != 1 not supported"
    stride = (stride, stride) if isinstance(stride, int) else tuple(stride)
    padding = (padding, padding) if isinstance(padding, int) else tuple(padding)
    out_dtype = x_nchw.dtype if out_dtype is None else out_dtype

    # Spectral normalization folded into the weight (column permutation below
    # does not change singular values, so normalize first).
    w_sn = _spectral_normalize(weight, n_iters=sn_iters)
    # (Cout, Cin, kh, kw) -> (Cout, kh*kw*Cin) in bf16, matching the patch ordering.
    w_mat = jnp.transpose(w_sn, (0, 2, 3, 1)).reshape(Cout, kh * kw * Cin)
    w_mat = w_mat.astype(jnp.bfloat16)
    b_col = bias.astype(jnp.float32).reshape(Cout, 1)

    patches, Ho, Wo = _im2col_nchw_bf16(x_nchw, (kh, kw), stride, padding, dilation)
    K = kh * kw * Cin
    HWo = Ho * Wo

    # Zero-pad to aligned extents (padding contributes 0 to the matmul; padded
    # output rows/cols are sliced off afterwards).
    K_pad = _round_up(K, 128)
    Cout_pad = _round_up(Cout, 8)
    out_bytes = jnp.dtype(out_dtype).itemsize
    tK, tCo, T = _pick_tiles(K_pad, Cout_pad, HWo, out_bytes)
    HW_pad = _round_up(HWo, T)

    patches = jnp.pad(patches, ((0, 0), (0, K_pad - K), (0, HW_pad - HWo)))
    w_mat = jnp.pad(w_mat, ((0, Cout_pad - Cout), (0, K_pad - K)))
    b_col = jnp.pad(b_col, ((0, Cout_pad - Cout), (0, 0)))

    n_co = Cout_pad // tCo
    n_t = HW_pad // T
    n_k = K_pad // tK

    out_flat = pl.pallas_call(
        _snconv_act_kernel,
        out_shape=jax.ShapeDtypeStruct((N, Cout_pad, HW_pad), out_dtype),
        grid=(N, n_co, n_t, n_k),
        in_specs=[
            pl.BlockSpec((1, tK, T), lambda n, c, t, k: (n, k, t)),
            pl.BlockSpec((tCo, tK), lambda n, c, t, k: (c, k)),
            pl.BlockSpec((tCo, 1), lambda n, c, t, k: (c, 0)),
        ],
        out_specs=pl.BlockSpec((1, tCo, T), lambda n, c, t, k: (n, c, t)),
        scratch_shapes=[pltpu.VMEM((tCo, T), jnp.float32)],
        compiler_params=pltpu.CompilerParams(
            dimension_semantics=("parallel", "parallel", "parallel", "arbitrary"),
            vmem_limit_bytes=32 * 1024 * 1024),
    )(patches, w_mat, b_col)

    return out_flat[:, :Cout, :HWo].reshape(N, Cout, Ho, Wo)


# --------------------------- demo / self-check ---------------------------

if __name__ == "__main__":
    key = jax.random.PRNGKey(0)
    k_w, k_b, k_x = jax.random.split(key, 3)

    N, Cin, H, W = 2, 4, 16, 16
    Cout, ksz = 8, 3
    bound = 1.0 / float(jnp.sqrt(Cin * ksz * ksz))
    weight = jax.random.uniform(k_w, (Cout, Cin, ksz, ksz), jnp.float32, -bound, bound)
    bias = jax.random.uniform(k_b, (Cout,), jnp.float32, -bound, bound)
    x = jax.random.normal(k_x, (N, Cin, H, W), jnp.float32)

    fwd = jax.jit(functools.partial(sn_conv_with_activation, stride=1, padding=1))
    out = jax.block_until_ready(fwd(x, weight, bias))
    assert out.shape == (N, Cout, H, W)
    assert bool(jnp.all(jnp.isfinite(out)))

    # Reference check against XLA conv (same spectral-normalized weight),
    # tolerance relaxed for bf16 matmul operands (f32 accumulation).
    w_sn = _spectral_normalize(weight)
    ref = jax.lax.conv_general_dilated(
        x, w_sn, window_strides=(1, 1), padding=((1, 1), (1, 1)),
        dimension_numbers=("NCHW", "OIHW", "NCHW"))
    ref = ref + bias[None, :, None, None]
    ref = jnp.where(ref >= 0.0, ref, 0.2 * ref)
    assert float(jnp.max(jnp.abs(out - ref))) < 5e-2

    print("KERNEL_OK")
</pallas_src>

<mosaic_0001>
module attributes {stable_mosaic.version = 11 : i64} {
  func.func @_snconv_act_kernel(%arg0: i32, %arg1: i32, %arg2: i32, %arg3: i32, %arg4: memref<1x128x256xbf16, #tpu.memory_space<vmem>>, %arg5: memref<8x128xbf16, #tpu.memory_space<vmem>>, %arg6: memref<8x1xf32, #tpu.memory_space<vmem>>, %arg7: memref<1x8x256xf32, #tpu.memory_space<vmem>>, %arg8: memref<8x256xf32, #tpu.memory_space<vmem>>) attributes {dimension_semantics = [#tpu.dimension_semantics<parallel>, #tpu.dimension_semantics<parallel>, #tpu.dimension_semantics<parallel>, #tpu.dimension_semantics<arbitrary>], iteration_bounds = array<i64: 2, 1, 1, 1>, scalar_prefetch = 0 : i64, scratch_operands = 1 : i64, tpu.core_type = #tpu.core_type<tc>, window_params = [{transform_indices = @transform_0, window_bounds = array<i64: 1, 128, 256>}, {transform_indices = @transform_1, window_bounds = array<i64: 8, 128>}, {transform_indices = @transform_2, window_bounds = array<i64: 8, 1>}, {transform_indices = @transform_3, window_bounds = array<i64: 1, 8, 256>}]} {
    %c0_i32 = arith.constant 0 : i32
    %0 = arith.cmpi eq, %arg3, %c0_i32 : i32
    %1 = arith.extui %0 : i1 to i32
    %c0_i32_0 = arith.constant 0 : i32
    %2 = arith.cmpi ne, %1, %c0_i32_0 : i32
    scf.if %2 {
      %cst_11 = arith.constant 0.000000e+00 : f32
      %13 = vector.broadcast %cst_11 : f32 to vector<8x256xf32>
      %c0_12 = arith.constant 0 : index
      %c0_13 = arith.constant 0 : index
      %14 = vector.load %arg8[%c0_12, %c0_13] : memref<8x256xf32, #tpu.memory_space<vmem>>, vector<8x256xf32>
      tpu.vector_store %arg8[%c0_12, %c0_13], %13 {strides = array<i32>} : memref<8x256xf32, #tpu.memory_space<vmem>>, vector<8x256xf32>,
    } else {
    }
    %c0 = arith.constant 0 : index
    %c0_1 = arith.constant 0 : index
    %3 = vector.load %arg8[%c0, %c0_1] : memref<8x256xf32, #tpu.memory_space<vmem>>, vector<8x256xf32>
    %c0_2 = arith.constant 0 : index
    %c0_3 = arith.constant 0 : index
    %4 = vector.load %arg5[%c0_2, %c0_3] : memref<8x128xbf16, #tpu.memory_space<vmem>>, vector<8x128xbf16>
    %c0_4 = arith.constant 0 : index
    %c0_5 = arith.constant 0 : index
    %c0_6 = arith.constant 0 : index
    %5 = vector.load %arg4[%c0_4, %c0_5, %c0_6] : memref<1x128x256xbf16, #tpu.memory_space<vmem>>, vector<1x128x256xbf16>
    %6 = vector.shape_cast %5 : vector<1x128x256xbf16> to vector<128x256xbf16>
    %cst = arith.constant dense<0.000000e+00> : vector<8x256xf32>
    %7 = tpu.matmul %4, %6, %cst {dimension_numbers = #tpu.dot_dimension_numbers<[1], [0], [0], [1], [0, 0, 1, 1], [], []>} : vector<8x128xbf16>, vector<128x256xbf16>, vector<8x256xf32> -> vector<8x256xf32>
    %8 = arith.addf %3, %7 : vector<8x256xf32>
    %c0_7 = arith.constant 0 : index
    %c0_8 = arith.constant 0 : index
    %9 = vector.load %arg8[%c0_7, %c0_8] : memref<8x256xf32, #tpu.memory_space<vmem>>, vector<8x256xf32>
    tpu.vector_store %arg8[%c0_7, %c0_8], %8 {strides = array<i32>} : memref<8x256xf32, #tpu.memory_space<vmem>>, vector<8x256xf32>,
    %c0_i32_9 = arith.constant 0 : i32
    %10 = arith.cmpi eq, %arg3, %c0_i32_9 : i32
    %11 = arith.extui %10 : i1 to i32
    %c0_i32_10 = arith.constant 0 : i32
    %12 = arith.cmpi ne, %11, %c0_i32_10 : i32
    scf.if %12 {
      %c0_11 = arith.constant 0 : index
      %c0_12 = arith.constant 0 : index
      %13 = vector.load %arg8[%c0_11, %c0_12] : memref<8x256xf32, #tpu.memory_space<vmem>>, vector<8x256xf32>
      %c0_13 = arith.constant 0 : index
      %c0_14 = arith.constant 0 : index
      %14 = vector.load %arg6[%c0_13, %c0_14] : memref<8x1xf32, #tpu.memory_space<vmem>>, vector<8x1xf32>
      %15 = vector.broadcast %14 : vector<8x1xf32> to vector<8x256xf32>
      %16 = arith.addf %13, %15 : vector<8x256xf32>
      %cst_15 = arith.constant 2.000000e-01 : f32
      %17 = vector.broadcast %cst_15 : f32 to vector<8x256xf32>
      %18 = arith.mulf %17, %16 : vector<8x256xf32>
      %19 = arith.maximumf %16, %18 : vector<8x256xf32>
      %c0_16 = arith.constant 0 : index
      %c0_17 = arith.constant 0 : index
      %c0_18 = arith.constant 0 : index
      %20 = vector.load %arg7[%c0_16, %c0_17, %c0_18] : memref<1x8x256xf32, #tpu.memory_space<vmem>>, vector<1x8x256xf32>
      %21 = vector.shape_cast %20 : vector<1x8x256xf32> to vector<8x256xf32>
      %22 = vector.shape_cast %19 : vector<8x256xf32> to vector<1x8x256xf32>
      tpu.vector_store %arg7[%c0_16, %c0_17, %c0_18], %22 {strides = array<i32>} : memref<1x8x256xf32, #tpu.memory_space<vmem>>, vector<1x8x256xf32>,
    } else {
    }
    return
  }
  func.func @transform_0(%arg0: i32, %arg1: i32, %arg2: i32, %arg3: i32) -> (i32, i32, i32) {
    %c0_i32 = arith.constant 0 : i32
    return %arg0, %arg3, %arg2 : i32, i32, i32
  }
  func.func @transform_1(%arg0: i32, %arg1: i32, %arg2: i32, %arg3: i32) -> (i32, i32) {
    %c0_i32 = arith.constant 0 : i32
    return %arg1, %arg3 : i32, i32
  }
  func.func @transform_2(%arg0: i32, %arg1: i32, %arg2: i32, %arg3: i32) -> (i32, i32) {
    %c0_i32 = arith.constant 0 : i32
    %c0_i32_0 = arith.constant 0 : i32
    return %arg1, %c0_i32 : i32, i32
  }
  func.func @transform_3(%arg0: i32, %arg1: i32, %arg2: i32, %arg3: i32) -> (i32, i32, i32) {
    %c0_i32 = arith.constant 0 : i32
    return %arg0, %arg1, %arg2 : i32, i32, i32
  }
}

</mosaic_0001>

<bundles_post_ra>
// kernel: sn_conv_with_activation.1
= control target key start
LH: loop header
LB: loop body
LE: loop exit
PB: predicated region body
PF: predicated region fallthrough
CT: control target
= control target key end

     0   :  { %s766_s12 = smov 0   ;;  %s768_s13 = smov 0   ;;  %s843_s0 = inlined_call_operand.vmem [shape: bf16[2,128,256], index: 0, kind: input, shape index: {}]   ;;  %s844_s1 = inlined_call_operand.vmem [shape: bf16[8,128], index: 1, kind: input, shape index: {}]   ;;  %s845_s2 = inlined_call_operand.vmem [shape: f32[8,1], index: 2, kind: input, shape index: {}]   ;;  %s846_s3 = inlined_call_operand.vmem [shape: f32[2,8,256], index: 3, kind: output, shape index: {}]  }
   0x1   :  { %s770_s14 = smov 0  }
   0x2 LB: > { %s39_s15 = sadd.s32 1, %s739_s13  ;;  %p606_p0 = scmp.ge.s32.totalorder %s743_s14, 1  ;;  %s743_s14 = sphi %s770_s14, %s13_s14   ;;  %s739_s13 = sphi %s768_s13, %s848_s13   ;;  %s735_s12 = sphi %s766_s12, %s847_s12  }
   0x3   : > { %p41_p1 = scmp.ge.s32.totalorder %s39_s15, 2  ;;  %p205_p2 = scmp.lt.s32.totalorder %s743_s14, 3 }
   0x5   : > { %s850_s15 = smov (%p41_p1, %s39_s15), 0  ;;  %p206_p3 = pnand %p606_p0, %p205_p2 }
   0x6   : > { %p259_p4 = scmp.lt.s32.totalorder (!%p206_p3), %s735_s12, 1 }
   0x7   : > { %209 = sbr.rel (%p206_p3) target bundleno = 184 (0xb8), region = 32 }
   0xc   : > { %s852_s12 = smov (!%p259_p4, %s735_s12), 1  ;;  %v438_v23 = vld [vmem:[%s845_s2] sm:$0xff]  ;;  %v745_v27 = vmov 0  }
   0xd   : > { %s677_s16 = sshll.u32 %s852_s12, 7  ;;  %720 = vset.pattern.permute.xlu0 %v745_v27  ;;  %v306_v50 = vld [vmem:[%s844_s1] sm:$0xf]  ;;  %s678_s24 = sshll.u32 %s852_s12, 4 }
   0xe   : > { %s790_s19 = scalar_lea.vmem %s843_s0, %s677_s16  ;;  %441 = vperm.xlu0 %720, %v438_v23   ;;  %s296_s27 = scalar_lea.vmem %s846_s3, %s678_s24 }
   0xf   : > { %v669_v0 = vld [vmem:[%s790_s19 + $0x70] sm:$0xf]  ;;  %v694_v1 = vld [vmem:[%s790_s19 + $0x74] sm:$0xf0]  ;;  %v693_v2 = vld [vmem:[%s790_s19 + $0x74] sm:$0xf] }
  0x10   : > { %v670_v3 = vor.u32 %v694_v1, %v669_v0  ;;  %v671_v4 = vld [vmem:[%s790_s19 + $0x78] sm:$0xf0]  ;;  %v661_v5 = vld [vmem:[%s790_s19 + $0x60] sm:$0xf]  ;;  %v692_v6 = vld [vmem:[%s790_s19 + $0x64] sm:$0xf0] }
  0x11   : > { %v674_v7 = vor.u32 %v693_v2, %v671_v4  ;;  %v691_v8 = vld [vmem:[%s790_s19 + $0x64] sm:$0xf]  ;;  %v663_v9 = vld [vmem:[%s790_s19 + $0x68] sm:$0xf0]  ;;  %v662_v10 = vor.u32 %v692_v6, %v661_v5  ;;  %v653_v12 = vld [vmem:[%s790_s19 + $0x50] sm:$0xf] }
  0x12   : > { %403 = vmatpush.bf16.msra.mxu0 %v670_v3  ;;  %v666_v11 = vor.u32 %v691_v8, %v663_v9  ;;  %v690_v13 = vld [vmem:[%s790_s19 + $0x54] sm:$0xf0]  ;;  %v689_v14 = vld [vmem:[%s790_s19 + $0x54] sm:$0xf]  ;;  %v655_v15 = vld [vmem:[%s790_s19 + $0x58] sm:$0xf0] }
  0x13   : > { %416 = vmatpush.bf16.msra.mxu1 %v674_v7  ;;  %v654_v16 = vor.u32 %v690_v13, %v653_v12  ;;  %v658_v17 = vor.u32 %v689_v14, %v655_v15  ;;  %v645_v18 = vld [vmem:[%s790_s19 + $0x40] sm:$0xf]  ;;  %v688_v19 = vld [vmem:[%s790_s19 + $0x44] sm:$0xf0]  ;;  %v687_v20 = vld [vmem:[%s790_s19 + $0x44] sm:$0xf] }
  0x14   : > { %v647_v21 = vld [vmem:[%s790_s19 + $0x48] sm:$0xf0]  ;;  %v646_v22 = vor.u32 %v688_v19, %v645_v18  ;;  %v637_v25 = vld [vmem:[%s790_s19 + $0x30] sm:$0xf]  ;;  %v686_v26 = vld [vmem:[%s790_s19 + $0x34] sm:$0xf0] }
  0x15   : > { %v650_v24 = vor.u32 %v687_v20, %v647_v21  ;;  %v685_v28 = vld [vmem:[%s790_s19 + $0x34] sm:$0xf]  ;;  %v639_v29 = vld [vmem:[%s790_s19 + $0x38] sm:$0xf0]  ;;  %v638_v30 = vor.u32 %v686_v26, %v637_v25  ;;  %v629_v32 = vld [vmem:[%s790_s19 + $0x20] sm:$0xf] }
  0x16   : > { %404 = vmatpush.bf16.msra.mxu0 %v662_v10  ;;  %v642_v31 = vor.u32 %v685_v28, %v639_v29  ;;  %v684_v33 = vld [vmem:[%s790_s19 + $0x24] sm:$0xf0]  ;;  %v683_v34 = vld [vmem:[%s790_s19 + $0x24] sm:$0xf]  ;;  %v631_v35 = vld [vmem:[%s790_s19 + $0x28] sm:$0xf0] }
  0x17   : > { %417 = vmatpush.bf16.msra.mxu1 %v666_v11  ;;  %v630_v36 = vor.u32 %v684_v33, %v629_v32  ;;  %v634_v37 = vor.u32 %v683_v34, %v631_v35  ;;  %v621_v38 = vld [vmem:[%s790_s19 + $0x10] sm:$0xf]  ;;  %v682_v39 = vld [vmem:[%s790_s19 + $0x14] sm:$0xf0]  ;;  %v681_v40 = vld [vmem:[%s790_s19 + $0x14] sm:$0xf] }
  0x18   : > { %v623_v41 = vld [vmem:[%s790_s19 + $0x18] sm:$0xf0]  ;;  %v622_v42 = vor.u32 %v682_v39, %v621_v38  ;;  %v613_v44 = vld [vmem:[%s790_s19] sm:$0xf]  ;;  %v680_v45 = vld [vmem:[%s790_s19 + $0x4] sm:$0xf0] }
  0x19   : > { %v626_v43 = vor.u32 %v681_v40, %v623_v41  ;;  %v679_v46 = vld [vmem:[%s790_s19 + $0x4] sm:$0xf]  ;;  %v615_v47 = vld [vmem:[%s790_s19 + $0x8] sm:$0xf0]  ;;  %v614_v48 = vor.u32 %v680_v45, %v613_v44 }
  0x1a   : > { %405 = vmatpush.bf16.msra.mxu0 %v654_v16  ;;  %v618_v49 = vor.u32 %v679_v46, %v615_v47 }
  0x1b   : > { %418 = vmatpush.bf16.msra.mxu1 %v658_v17 }
  0x1e   : > { %406 = vmatpush.bf16.msra.mxu0 %v646_v22 }
  0x1f   : > { %419 = vmatpush.bf16.msra.mxu1 %v650_v24 }
  0x22   : > { %407 = vmatpush.bf16.msra.mxu0 %v638_v30 }
  0x23   : > { %420 = vmatpush.bf16.msra.mxu1 %v642_v31 }
  0x26   : > { %408 = vmatpush.bf16.msra.mxu0 %v630_v36 }
  0x27   : > { %421 = vmatpush.bf16.msra.mxu1 %v634_v37 }
  0x2a   : > { %409 = vmatpush.bf16.msra.mxu0 %v622_v42 }
  0x2b   : > { %422 = vmatpush.bf16.msra.mxu1 %v626_v43 }
  0x2e   : > { %410 = vmatpush.bf16.msra.mxu0 %v614_v48 }
  0x2f   : > { %423 = vmatpush.bf16.msra.mxu1 %v618_v49 }
  0x31   : > { %411 = vmatmul.bf16.vlgmr.msra.gmra.mxu0 %v306_v50 }
  0x32   : > { %424 = vmatmul.bf16.vlgmr.msra.gmra.mxu1 %v306_v50 }
  0x80   : > { %v442_v51 = vpop.permute.xlu0 %441 }
  0xae   : > { %v412_v52 = vpop.f32.mrf.mxu0 }
  0xaf   : > { %v444_v53 = vadd.f32 %v442_v51, %v412_v52  ;;  %v425_v54 = vpop.f32.mrf.mxu1 }
  0xb0   : > { %v445_v55 = vadd.f32 %v442_v51, %v425_v54 }
  0xb1   : > { %v446_v56 = vmul.f32 0.2, %v444_v53 }
  0xb2   : > { %v447_v57 = vmul.f32 0.2, %v445_v55 }
  0xb3   : > { %v448_v58 = vmax.f32 %v444_v53, %v446_v56 }
  0xb4   : > { %v449_v59 = vmax.f32 %v445_v55, %v447_v57 }
  0xb5   : > { %450 = vst [vmem:[%s296_s27] sm:$0xff] %v448_v58 }
  0xb6   : > { %451 = vst [vmem:[%s296_s27 + $0x8] sm:$0xff] %v449_v59  ;;  %v414_v60 = vpop.f32.mrf.mxu0 }
  0xb7   : > { %v427_v61 = vpop.f32.mrf.mxu1 }
  0xb8 PF: > { %s13_s14 = sadd.s32 1, %s743_s14   ;;  %s847_s12 = smov %s739_s13 }
  0xb9   : > { %p10_p5 = scmp.ge.s32.totalorder %s13_s14, 4   ;;  %s848_s13 = smov %s850_s15 }
  0xbb   :  { %12 = sbr.rel (!%p10_p5) target bundleno = 2 (0x2), region = 76 }

</bundles_post_ra>
